<compile_context>
chip_gen: v6e
topology: v6e:2x2x1
jax: 0.10.0
libtpu: 0.0.40
codegen_flags: <defaults>
</compile_context>

<pallas_src>
import functools

import jax
import jax.numpy as jnp
from jax.experimental import pallas as pl
from jax.experimental.pallas import tpu as pltpu


# ---------------------------------------------------------------------------
# Row-tiled linear kernels: y = x @ w (+ b).  Operands arrive in the chosen MXU
# dtype (f32 or bf16); accumulation and output are f32.
# ---------------------------------------------------------------------------
def _linear_bias_kernel(x_ref, w_ref, b_ref, o_ref):
    o_ref[...] = jnp.dot(x_ref[...], w_ref[...],
                         preferred_element_type=jnp.float32) + b_ref[...]


def _linear_nobias_kernel(x_ref, w_ref, o_ref):
    o_ref[...] = jnp.dot(x_ref[...], w_ref[...],
                         preferred_element_type=jnp.float32)


def pallas_linear(x, w, b=None, *, tile_rows=128):
    n, fin = x.shape
    fout = w.shape[1]
    tile = min(tile_rows, max(8, n))
    n_pad = ((n + tile - 1) // tile) * tile
    if n_pad != n:
        x = jnp.pad(x, ((0, n_pad - n), (0, 0)))

    in_specs = [
        pl.BlockSpec((tile, fin), lambda i: (i, 0)),
        pl.BlockSpec((fin, fout), lambda i: (0, 0)),
    ]
    operands = [x, w]
    kernel = _linear_nobias_kernel
    if b is not None:
        in_specs.append(pl.BlockSpec((1, fout), lambda i: (0, 0)))
        operands.append(b.reshape(1, fout).astype(jnp.float32))
        kernel = _linear_bias_kernel

    y = pl.pallas_call(
        kernel,
        out_shape=jax.ShapeDtypeStruct((n_pad, fout), jnp.float32),
        grid=(n_pad // tile,),
        in_specs=in_specs,
        out_specs=pl.BlockSpec((tile, fout), lambda i: (i, 0)),
        compiler_params=pltpu.CompilerParams(dimension_semantics=("parallel",)),
    )(*operands)
    return y[:n] if n_pad != n else y


# ---------------------------------------------------------------------------
# Fused GATv2 attention (online softmax over source tiles) + aggregation +
# GELU + residual + LayerNorm.  Grid = (dst tiles [parallel], src tiles [arbitrary]).
# ---------------------------------------------------------------------------
def _gatv2_fused_kernel(xr_ref, xlt_ref, xl_ref, adj_ref, e_ref, att_ref,
                        cbias_ref, res_ref, gamma_ref, beta_ref,
                        out_ref, m_ref, l_ref, acc_ref,
                        *, heads, head_dim, eps, approx_recip):
    j = pl.program_id(1)
    nj = pl.num_programs(1)
    C = head_dim

    @pl.when(j == 0)
    def _init():
        m_ref[...] = jnp.full(m_ref.shape, -jnp.inf, jnp.float32)
        l_ref[...] = jnp.zeros(l_ref.shape, jnp.float32)
        acc_ref[...] = jnp.zeros(acc_ref.shape, jnp.float32)

    adj = adj_ref[...] != 0                      # (tI, tJ) edge mask
    neg = jnp.float32(-1e30)

    for h in range(heads):                       # static unroll (heads is small)
        lo, hi = h * C, (h + 1) * C
        # Pre-activation messages built in-kernel (no N^2*HC materialisation in XLA):
        #   pre[i, c, j] = x_r[i, c] + x_l[j, c] + e_proj[i, c, j]
        # Layout: source nodes on the 128 lanes, head channels on sublanes.
        pre = (e_ref[:, lo:hi, :].astype(jnp.float32)
               + xlt_ref[lo:hi, :][None, :, :]
               + xr_ref[:, lo:hi, :])                            # (tI, C, tJ)
        pre = jnp.where(pre > 0, pre, 0.2 * pre)                 # LeakyReLU(0.2)
        att_h = att_ref[lo:hi, :]                                # (C, 1)
        logits = jnp.sum(pre * att_h[None, :, :], axis=1)        # (tI, tJ)
        logits = jnp.where(adj, logits, neg)

        # --- flash-style online softmax across source tiles ---
        m_prev = m_ref[:, lo:lo + 1]                             # (tI, 1)
        m_new = jnp.maximum(m_prev, jnp.max(logits, axis=-1, keepdims=True))
        corr = jnp.exp(m_prev - m_new)                           # 0 on first visit
        p = jnp.exp(logits - m_new)
        p = jnp.where(adj, p, 0.0)                               # exact zero off-edges
        l_ref[:, lo:hi] = corr * l_ref[:, lo:hi] + jnp.sum(p, axis=-1, keepdims=True)
        m_ref[:, lo:lo + 1] = m_new

        # Per-head aggregation: one MXU dot, accumulated into the head's column slice.
        agg = jnp.dot(p.astype(xl_ref.dtype), xl_ref[:, lo:hi],
                      preferred_element_type=jnp.float32)        # (tI, C)
        acc_ref[:, lo:hi] = corr * acc_ref[:, lo:hi] + agg

    @pl.when(j == nj - 1)
    def _epilogue():
        denom = jnp.maximum(l_ref[...], jnp.float32(1e-30))
        if approx_recip:
            inv = pl.reciprocal(denom, approx=True)              # EUP slot
        else:
            inv = jnp.float32(1.0) / denom
        conv = acc_ref[...] * inv + cbias_ref[...]
        # exact (erf) GELU -- matches torch.nn.GELU(approximate='none')
        act = 0.5 * conv * (1.0 + jax.lax.erf(conv * jnp.float32(0.7071067811865476)))
        y = act + res_ref[...]
        # LayerNorm(out_channels), eps = 1e-5
        mean = jnp.mean(y, axis=-1, keepdims=True)
        cent = y - mean
        var = jnp.mean(cent * cent, axis=-1, keepdims=True)
        out_ref[...] = cent * jax.lax.rsqrt(var + eps) * gamma_ref[...] + beta_ref[...]
    # TODO(synk): nn.Dropout (attention dropout inside GATv2Conv and on the layer
    # output) is identity at inference; training-mode dropout is not implemented.


def gatv2_conv_layer(x, edge_index, edge_attr, params, *, heads,
                     tile_i=128, tile_j=128, eps=1e-5, use_bf16=True):
    """Inference forward of GATv2ConvLayer (heads > 1, concat=True path).

    x:          [N, in_channels]  f32
    edge_index: [2, E] int32  (row 0 = source node, row 1 = destination node)
    edge_attr:  [E, edge_dim] f32
    params:     weights in (in_features, out_features) orientation.  Omit
                "w_res"/"b_res" for an identity residual (in == out).
    Assumes no duplicate (dst, src) edges (dense formulation; duplicates would be
    silently overwritten).  Isolated destination nodes reduce to conv[i] = bias.
    """
    n, fin = x.shape
    wl, bl = params["w_lin_l"], params["b_lin_l"]
    wr, br = params["w_lin_r"], params["b_lin_r"]
    we = params["w_lin_edge"]
    att = params["att"]
    cbias = params["conv_bias"]
    gamma, beta = params["ln_gamma"], params["ln_beta"]
    wres = params.get("w_res")
    bres = params.get("b_res")

    hc = wl.shape[1]
    assert heads > 1 and hc % heads == 0      # module uses concat=True when heads > 1
    c = hc // heads
    out_dim = gamma.shape[0]
    assert out_dim == hc
    tile_i = min(tile_i, n)
    tile_j = min(tile_j, n)
    assert n % tile_i == 0 and n % tile_j == 0, "pad num_nodes to a multiple of the tiles"
    assert tile_j == n or tile_j % 128 == 0, "source tile must be lane-aligned"

    cdt = jnp.bfloat16 if use_bf16 else jnp.float32

    # ---- lin_l | lin_r | res_proj fused into ONE row-tiled matmul over x ----
    w_node = [wl, wr]
    b_node = [bl, br]
    if wres is not None:
        w_node.append(wres)
        b_node.append(bres)
    w_node = jnp.concatenate(w_node, axis=1)
    b_node = jnp.concatenate(b_node, axis=0)
    proj = pallas_linear(x.astype(cdt), w_node.astype(cdt), b_node)     # (N, 2*HC[+out])
    x_l = proj[:, :hc]
    x_r = proj[:, hc:2 * hc]
    if wres is not None:
        res = proj[:, 2 * hc:2 * hc + out_dim]
    else:
        assert fin == out_dim, "identity residual requires in_channels == out_channels"
        res = x.astype(jnp.float32)

    # ---- lin_edge (bias-free in PyG) ----
    e_proj = pallas_linear(edge_attr.astype(cdt), we.astype(cdt))       # (E, HC) f32

    # ---- edge_index -> dense per-(dst, src) structures.  Data-dependent scatter
    #      (no clean Pallas TPU equivalent, stays in plain JAX); only an int8 mask
    #      and the projected edge features are densified — no (N,N,HC) pre tensor
    #      and no XLA transpose.
    src = edge_index[0]
    dst = edge_index[1]
    adj = jnp.zeros((n, n), jnp.int8).at[dst, src].set(jnp.ones(src.shape, jnp.int8))
    e_dense = jnp.zeros((n, hc, n), cdt).at[dst, :, src].set(e_proj.astype(cdt))

    xr3 = x_r.reshape(n, hc, 1)     # channels on sublanes, lane-broadcast inside kernel
    xlt = x_l.T                     # (HC, N): channels on sublanes, sources on lanes
    xl_c = x_l.astype(cdt)          # MXU operand for the per-head aggregation matmul

    kernel = functools.partial(_gatv2_fused_kernel, heads=heads, head_dim=c,
                               eps=eps, approx_recip=use_bf16)
    return pl.pallas_call(
        kernel,
        out_shape=jax.ShapeDtypeStruct((n, out_dim), jnp.float32),
        grid=(n // tile_i, n // tile_j),
        in_specs=[
            pl.BlockSpec((tile_i, hc, 1), lambda i, j: (i, 0, 0)),       # x_r (dst)
            pl.BlockSpec((hc, tile_j), lambda i, j: (0, j)),             # x_l^T (src)
            pl.BlockSpec((tile_j, hc), lambda i, j: (j, 0)),             # x_l (aggregation)
            pl.BlockSpec((tile_i, tile_j), lambda i, j: (i, j)),         # adjacency, int8
            pl.BlockSpec((tile_i, hc, tile_j), lambda i, j: (i, 0, j)),  # dense e_proj
            pl.BlockSpec((hc, 1), lambda i, j: (0, 0)),                  # att (H*C, 1)
            pl.BlockSpec((1, hc), lambda i, j: (0, 0)),                  # conv bias
            pl.BlockSpec((tile_i, out_dim), lambda i, j: (i, 0)),        # residual branch
            pl.BlockSpec((1, out_dim), lambda i, j: (0, 0)),             # LN gamma
            pl.BlockSpec((1, out_dim), lambda i, j: (0, 0)),             # LN beta
        ],
        out_specs=pl.BlockSpec((tile_i, out_dim), lambda i, j: (i, 0)),
        scratch_shapes=[
            pltpu.VMEM((tile_i, hc), jnp.float32),    # running max (per-head columns)
            pltpu.VMEM((tile_i, hc), jnp.float32),    # running softmax denominator
            pltpu.VMEM((tile_i, hc), jnp.float32),    # running weighted sum (numerator)
        ],
        compiler_params=pltpu.CompilerParams(
            dimension_semantics=("parallel", "arbitrary")),
    )(xr3, xlt, xl_c, adj, e_dense, att.reshape(hc, 1).astype(jnp.float32),
      cbias.reshape(1, hc), res, gamma.reshape(1, out_dim), beta.reshape(1, out_dim))


# ---------------------------------------------------------------------------
# Pure-JAX reference (edge-list form, mirrors PyG GATv2Conv + the layer epilogue)
# ---------------------------------------------------------------------------
def gatv2_conv_layer_ref(x, edge_index, edge_attr, params, *, heads, eps=1e-5):
    hp = jax.lax.Precision.HIGHEST
    n = x.shape[0]
    wl, bl = params["w_lin_l"], params["b_lin_l"]
    wr, br = params["w_lin_r"], params["b_lin_r"]
    we = params["w_lin_edge"]
    att = params["att"]
    cbias = params["conv_bias"]
    gamma, beta = params["ln_gamma"], params["ln_beta"]
    wres = params.get("w_res")
    bres = params.get("b_res")
    hc = wl.shape[1]
    c = hc // heads
    src, dst = edge_index[0], edge_index[1]

    xl = (jnp.dot(x, wl, precision=hp) + bl).reshape(n, heads, c)
    xr = (jnp.dot(x, wr, precision=hp) + br).reshape(n, heads, c)
    e = jnp.dot(edge_attr, we, precision=hp).reshape(-1, heads, c)

    msg = xr[dst] + xl[src] + e
    msg = jnp.where(msg > 0, msg, 0.2 * msg)
    logits = jnp.sum(msg * att[None], axis=-1)                      # (E, H)
    m = jax.ops.segment_max(logits, dst, num_segments=n)
    p = jnp.exp(logits - m[dst])
    denom = jax.ops.segment_sum(p, dst, num_segments=n)
    alpha = p / denom[dst]
    agg = jax.ops.segment_sum(alpha[:, :, None] * xl[src], dst, num_segments=n)
    conv = agg.reshape(n, hc) + cbias
    act = 0.5 * conv * (1.0 + jax.lax.erf(conv / jnp.sqrt(2.0)))
    res = jnp.dot(x, wres, precision=hp) + bres if wres is not None else x
    y = act + res
    mean = y.mean(-1, keepdims=True)
    var = ((y - mean) ** 2).mean(-1, keepdims=True)
    return (y - mean) * jax.lax.rsqrt(var + eps) * gamma + beta


if __name__ == "__main__":
    # Small protein-like graph consistent with the module:
    # 256 residues, 4 incoming edges each, in=64, out=32, heads=4, edge_dim=8.
    num_nodes = 256
    in_channels = 64
    out_channels = 32
    heads = 4
    edge_dim = 8
    hc = out_channels                      # heads * (out_channels // heads)

    # deterministic connectivity (no duplicates, no self loops, no isolated nodes)
    offsets = jnp.array([1, 2, 5, 17], dtype=jnp.int32)
    dst = jnp.repeat(jnp.arange(num_nodes, dtype=jnp.int32), 4)
    src = (dst + jnp.tile(offsets, num_nodes)) % num_nodes
    edge_index = jnp.stack([src, dst])     # [2, 1024]
    num_edges = edge_index.shape[1]

    key = jax.random.PRNGKey(0)
    ks = jax.random.split(key, 12)
    x = jax.random.normal(ks[0], (num_nodes, in_channels), jnp.float32)
    edge_attr = jax.random.normal(ks[1], (num_edges, edge_dim), jnp.float32)

    def glorot(k, shape):
        return jax.random.normal(k, shape, jnp.float32) / jnp.sqrt(jnp.float32(shape[0]))

    params = {
        "w_lin_l": glorot(ks[2], (in_channels, hc)),
        "b_lin_l": 0.02 * jax.random.normal(ks[3], (hc,), jnp.float32),
        "w_lin_r": glorot(ks[4], (in_channels, hc)),
        "b_lin_r": 0.02 * jax.random.normal(ks[5], (hc,), jnp.float32),
        "w_lin_edge": glorot(ks[6], (edge_dim, hc)),
        "att": glorot(ks[7], (heads, out_channels // heads)),
        "conv_bias": 0.02 * jax.random.normal(ks[8], (hc,), jnp.float32),
        "w_res": glorot(ks[9], (in_channels, out_channels)),
        "b_res": 0.02 * jax.random.normal(ks[10], (out_channels,), jnp.float32),
        "ln_gamma": 1.0 + 0.1 * jax.random.normal(ks[11], (out_channels,), jnp.float32),
        "ln_beta": jnp.zeros((out_channels,), jnp.float32),
    }

    ref = jax.block_until_ready(
        gatv2_conv_layer_ref(x, edge_index, edge_attr, params, heads=heads))

    # Exact path (f32 MXU operands, exact divide): validates the algorithm tightly.
    out_f32 = gatv2_conv_layer(x, edge_index, edge_attr, params, heads=heads,
                               tile_i=128, tile_j=128, use_bf16=False)
    out_f32 = jax.block_until_ready(out_f32)
    assert out_f32.shape == (num_nodes, out_channels)
    assert bool(jnp.isfinite(out_f32).all())
    assert float(jnp.max(jnp.abs(out_f32 - ref))) < 5e-4, "f32 path mismatch vs reference"

    # Fast path (bf16 MXU operands + EUP approximate reciprocal); softmax, accumulation
    # and LayerNorm stay f32, so only bf16 input rounding shows up (looser tolerance).
    out_bf16 = gatv2_conv_layer(x, edge_index, edge_attr, params, heads=heads,
                                tile_i=128, tile_j=128, use_bf16=True)
    out_bf16 = jax.block_until_ready(out_bf16)
    assert out_bf16.shape == (num_nodes, out_channels)
    assert bool(jnp.isfinite(out_bf16).all())
    assert float(jnp.max(jnp.abs(out_bf16 - ref))) < 1.5e-1, "bf16 path mismatch"

    print("KERNEL_OK")
</pallas_src>

<mosaic_0001>
module attributes {stable_mosaic.version = 11 : i64} {
  func.func @_linear_bias_kernel(%arg0: i32, %arg1: memref<128x64xf32, #tpu.memory_space<vmem>>, %arg2: memref<64x96xf32, #tpu.memory_space<vmem>>, %arg3: memref<1x96xf32, #tpu.memory_space<vmem>>, %arg4: memref<128x96xf32, #tpu.memory_space<vmem>>) attributes {dimension_semantics = [#tpu.dimension_semantics<parallel>], iteration_bounds = array<i64: 2>, scalar_prefetch = 0 : i64, scratch_operands = 0 : i64, tpu.core_type = #tpu.core_type<tc>, window_params = [{transform_indices = @transform_0, window_bounds = array<i64: 128, 64>}, {pipeline_mode = #tpu.pipeline_mode<synchronous>, transform_indices = @transform_1, window_bounds = array<i64: 64, 96>}, {pipeline_mode = #tpu.pipeline_mode<synchronous>, transform_indices = @transform_2, window_bounds = array<i64: 1, 96>}, {transform_indices = @transform_3, window_bounds = array<i64: 128, 96>}]} {
    %c0 = arith.constant 0 : index
    %c0_0 = arith.constant 0 : index
    %0 = vector.load %arg1[%c0, %c0_0] : memref<128x64xf32, #tpu.memory_space<vmem>>, vector<128x64xf32>
    %c0_1 = arith.constant 0 : index
    %c0_2 = arith.constant 0 : index
    %1 = vector.load %arg2[%c0_1, %c0_2] : memref<64x96xf32, #tpu.memory_space<vmem>>, vector<64x96xf32>
    %cst = arith.constant dense<0.000000e+00> : vector<128x96xf32>
    %2 = tpu.matmul %0, %1, %cst {dimension_numbers = #tpu.dot_dimension_numbers<[1], [0], [0], [1], [0, 0, 1, 1], [], []>} : vector<128x64xf32>, vector<64x96xf32>, vector<128x96xf32> -> vector<128x96xf32>
    %c0_3 = arith.constant 0 : index
    %c0_4 = arith.constant 0 : index
    %3 = vector.load %arg3[%c0_3, %c0_4] : memref<1x96xf32, #tpu.memory_space<vmem>>, vector<1x96xf32>
    %4 = vector.broadcast %3 : vector<1x96xf32> to vector<128x96xf32>
    %5 = arith.addf %2, %4 : vector<128x96xf32>
    %c0_5 = arith.constant 0 : index
    %c0_6 = arith.constant 0 : index
    %6 = vector.load %arg4[%c0_5, %c0_6] : memref<128x96xf32, #tpu.memory_space<vmem>>, vector<128x96xf32>
    tpu.vector_store %arg4[%c0_5, %c0_6], %5 {strides = array<i32>} : memref<128x96xf32, #tpu.memory_space<vmem>>, vector<128x96xf32>,
    return
  }
  func.func @transform_0(%arg0: i32) -> (i32, i32) {
    %c0_i32 = arith.constant 0 : i32
    %c0_i32_0 = arith.constant 0 : i32
    return %arg0, %c0_i32 : i32, i32
  }
  func.func @transform_1(%arg0: i32) -> (i32, i32) {
    %c0_i32 = arith.constant 0 : i32
    %c0_i32_0 = arith.constant 0 : i32
    %c0_i32_1 = arith.constant 0 : i32
    return %c0_i32, %c0_i32_0 : i32, i32
  }
  func.func @transform_2(%arg0: i32) -> (i32, i32) {
    %c0_i32 = arith.constant 0 : i32
    %c0_i32_0 = arith.constant 0 : i32
    %c0_i32_1 = arith.constant 0 : i32
    return %c0_i32, %c0_i32_0 : i32, i32
  }
  func.func @transform_3(%arg0: i32) -> (i32, i32) {
    %c0_i32 = arith.constant 0 : i32
    %c0_i32_0 = arith.constant 0 : i32
    return %arg0, %c0_i32 : i32, i32
  }
}

</mosaic_0001>

<bundles_post_ra>
// kernel: tpu_custom_call.1
= control target key start
LH: loop header
LB: loop body
LE: loop exit
PB: predicated region body
PF: predicated region fallthrough
CT: control target
= control target key end

     0   :  { %s616_s12 = smov 0   ;;  %s735_s0 = inlined_call_operand.vmem [shape: f32[256,64], index: 0, kind: input, shape index: {}]   ;;  %s736_s1 = inlined_call_operand.vmem [shape: f32[64,96], index: 1, kind: input, shape index: {}]   ;;  %s737_s2 = inlined_call_operand.vmem [shape: f32[1,96], index: 2, kind: input, shape index: {}]   ;;  %s738_s3 = inlined_call_operand.vmem [shape: f32[256,96], index: 3, kind: output, shape index: {}]  }
   0x1 LB: > { %s472_s13 = sadd.s32 4294967295, %s594_s12   ;;  %p476_p0 = scmp.ge.s32.totalorder %s594_s12, 1  ;;  %s594_s12 = sphi %s616_s12, %s13_s12  }
   0x2   : > { %p138_p1 = scmp.lt.s32.totalorder %s594_s12, 3 }
   0x4   : > { %p139_p2 = pnand %p476_p0, %p138_p1 }
   0x5   : > { %s477_s18 = sshll.u32 (!%p139_p2), %s472_s13, 4 }
   0x6   : > { %142 = sbr.rel (%p139_p2) target bundleno = 239 (0xef), region = 32  ;;  %p163_p3 = scmp.lt.s32.totalorder (!%p139_p2), %s477_s18, 31 }
   0xb   : > { %v197_v0 = vld [vmem:[%s736_s1 + $0x38] sm:$0xff]  ;;  %v196_v1 = vld [vmem:[%s736_s1 + $0x30] sm:$0xff]  ;;  %v195_v2 = vld [vmem:[%s736_s1 + $0x28] sm:$0xff]  ;;  %s740_s18 = smov (!%p163_p3, %s477_s18), 31  ;;  %vm205_vm0 = vcmask 523264   ;;  %vm399_vm1 = vcmask 785408  }
   0xc   : > { %524 = vmatprep.subr.mxu0 %v197_v0  ;;  %564 = vmatprep.subr.mxu1 %v197_v0  ;;  %v194_v3 = vld [vmem:[%s736_s1 + $0x20] sm:$0xff]  ;;  %v193_v4 = vld [vmem:[%s736_s1 + $0x18] sm:$0xff]  ;;  %v192_v5 = vld [vmem:[%s736_s1 + $0x10] sm:$0xff]  ;;  %s478_s27 = sshll.u32 %s740_s18, 3 }
   0xd   : > { %525 = vmatpush3.msra.mxu0 %v197_v0  ;;  %572 = vmatpush3.msra.mxu1 %v197_v0  ;;  %v191_v6 = vld [vmem:[%s736_s1 + $0x8] sm:$0xff]  ;;  %s653_s5 = scalar_lea.vmem %s735_s0, %s478_s27  ;;  %v190_v7 = vld [vmem:[%s736_s1] sm:$0xff]  ;;  %s698_s13 = scalar_lea.vmem %s738_s3, %s478_s27 }
   0xe   : > { %526 = vmatprep.subr.mxu0 %v196_v1  ;;  %565 = vmatprep.subr.mxu1 %v196_v1  ;;  %v174_v8 = vld [vmem:[%s653_s5] sm:$0xff]  ;;  %v175_v10 = vld [vmem:[%s653_s5 + $0x8] sm:$0xff]  ;;  %v176_v12 = vld [vmem:[%s653_s5 + $0x10] sm:$0xff] }
   0xf   : > { %527 = vmatpush3.msra.mxu0 %v196_v1  ;;  %573 = vmatpush3.msra.mxu1 %v196_v1  ;;  %v182_v9 = vld [vmem:[%s653_s5 + $0x40] sm:$0xff]  ;;  %v183_v11 = vld [vmem:[%s653_s5 + $0x48] sm:$0xff]  ;;  %v184_v13 = vld [vmem:[%s653_s5 + $0x50] sm:$0xff] }
  0x10   : > { %528 = vmatprep.subr.mxu0 %v195_v2  ;;  %566 = vmatprep.subr.mxu1 %v195_v2  ;;  %v177_v14 = vld [vmem:[%s653_s5 + $0x18] sm:$0xff]  ;;  %v178_v16 = vld [vmem:[%s653_s5 + $0x20] sm:$0xff]  ;;  %v179_v18 = vld [vmem:[%s653_s5 + $0x28] sm:$0xff] }
  0x11   : > { %529 = vmatpush3.msra.mxu0 %v195_v2  ;;  %574 = vmatpush3.msra.mxu1 %v195_v2  ;;  %v185_v15 = vld [vmem:[%s653_s5 + $0x58] sm:$0xff]  ;;  %v186_v17 = vld [vmem:[%s653_s5 + $0x60] sm:$0xff]  ;;  %v187_v19 = vld [vmem:[%s653_s5 + $0x68] sm:$0xff] }
  0x12   : > { %530 = vmatprep.subr.mxu0 %v194_v3  ;;  %567 = vmatprep.subr.mxu1 %v194_v3  ;;  %v180_v20 = vld [vmem:[%s653_s5 + $0x30] sm:$0xff]  ;;  %v181_v22 = vld [vmem:[%s653_s5 + $0x38] sm:$0xff]  ;;  %v481_v24 = vld [vmem:[%s737_s2] ss:$0 sm:$0xff] }
  0x13   : > { %531 = vmatpush3.msra.mxu0 %v194_v3  ;;  %575 = vmatpush3.msra.mxu1 %v194_v3  ;;  %v188_v21 = vld [vmem:[%s653_s5 + $0x70] sm:$0xff]  ;;  %v189_v23 = vld [vmem:[%s653_s5 + $0x78] sm:$0xff] }
  0x14   : > { %532 = vmatprep.subr.mxu0 %v193_v4  ;;  %568 = vmatprep.subr.mxu1 %v193_v4 }
  0x15   : > { %533 = vmatpush3.msra.mxu0 %v193_v4  ;;  %576 = vmatpush3.msra.mxu1 %v193_v4 }
  0x16   : > { %534 = vmatprep.subr.mxu0 %v192_v5  ;;  %569 = vmatprep.subr.mxu1 %v192_v5 }
  0x17   : > { %535 = vmatpush3.msra.mxu0 %v192_v5  ;;  %577 = vmatpush3.msra.mxu1 %v192_v5 }
  0x18   : > { %536 = vmatprep.subr.mxu0 %v191_v6  ;;  %570 = vmatprep.subr.mxu1 %v191_v6 }
  0x19   : > { %537 = vmatpush3.msra.mxu0 %v191_v6  ;;  %578 = vmatpush3.msra.mxu1 %v191_v6 }
  0x1a   : > { %538 = vmatprep.subr.mxu0 %v190_v7  ;;  %571 = vmatprep.subr.mxu1 %v190_v7 }
  0x1b   : > { %539 = vmatpush3.msra.mxu0 %v190_v7  ;;  %579 = vmatpush3.msra.mxu1 %v190_v7 }
  0x1c   : > { %540 = vmatprep.mubr.msk.f32.mxu0 %vm205_vm0, %v174_v8  ;;  %552 = vmatprep.mubr.msk.f32.mxu1 %vm205_vm0, %v182_v9 }
  0x1d   : > { %541 = vmatmul.mubr.msk.f32.vlgmr.msra.gmra.mxu0 %vm205_vm0, %v175_v10  ;;  %553 = vmatmul.mubr.msk.f32.vlgmr.msra.gmra.mxu1 %vm205_vm0, %v183_v11 }
  0x1e   : > { %543 = vmatprep.mubr.msk.f32.mxu0 %vm205_vm0, %v176_v12  ;;  %555 = vmatprep.mubr.msk.f32.mxu1 %vm205_vm0, %v184_v13 }
  0x21   : > { %544 = vmatmul.mubr.msk.f32.gmra.mxu0 %vm205_vm0, %v177_v14  ;;  %556 = vmatmul.mubr.msk.f32.gmra.mxu1 %vm205_vm0, %v185_v15 }
  0x22   : > { %546 = vmatprep.mubr.msk.f32.mxu0 %vm205_vm0, %v178_v16  ;;  %558 = vmatprep.mubr.msk.f32.mxu1 %vm205_vm0, %v186_v17 }
  0x25   : > { %547 = vmatmul.mubr.msk.f32.gmra.mxu0 %vm205_vm0, %v179_v18  ;;  %559 = vmatmul.mubr.msk.f32.gmra.mxu1 %vm205_vm0, %v187_v19 }
  0x26   : > { %549 = vmatprep.mubr.msk.f32.mxu0 %vm205_vm0, %v180_v20  ;;  %561 = vmatprep.mubr.msk.f32.mxu1 %vm205_vm0, %v188_v21 }
  0x29   : > { %550 = vmatmul.mubr.msk.f32.gmra.mxu0 %vm205_vm0, %v181_v22  ;;  %562 = vmatmul.mubr.msk.f32.gmra.mxu1 %vm205_vm0, %v189_v23 }
  0xdd   : > { %v542_v25 = vpop.f32.mrf.mxu0  ;;  %v554_v26 = vpop.f32.mrf.mxu1 }
  0xde   : > { %v326_v27 = vadd.f32 %v542_v25, %v481_v24  ;;  %v366_v28 = vadd.f32 %v554_v26, %v481_v24 }
  0xdf   : > { %v320_v29 = vpop.f32.mrf.mxu0  ;;  %v360_v30 = vpop.f32.mrf.mxu1 }
  0xe0   : > { %401 = vst.msk [vmem:[%s698_s13 + $0x8] sm:$0xff] %vm399_vm1, %v326_v27  ;;  %409 = vst.msk [vmem:[%s698_s13 + $0x48] sm:$0xff] %vm399_vm1, %v366_v28  ;;  %v321_v31 = vadd.f32 %v481_v24, %v320_v29  ;;  %v361_v32 = vadd.f32 %v481_v24, %v360_v30 }
  0xe1   : > { %v545_v33 = vpop.f32.mrf.mxu0  ;;  %v557_v34 = vpop.f32.mrf.mxu1 }
  0xe2   : > { %400 = vst.msk [vmem:[%s698_s13] sm:$0xff] %vm399_vm1, %v321_v31  ;;  %408 = vst.msk [vmem:[%s698_s13 + $0x40] sm:$0xff] %vm399_vm1, %v361_v32  ;;  %v336_v35 = vadd.f32 %v545_v33, %v481_v24  ;;  %v376_v36 = vadd.f32 %v557_v34, %v481_v24 }
  0xe3   : > { %v330_v37 = vpop.f32.mrf.mxu0  ;;  %v370_v38 = vpop.f32.mrf.mxu1 }
  0xe4   : > { %403 = vst.msk [vmem:[%s698_s13 + $0x18] sm:$0xff] %vm399_vm1, %v336_v35  ;;  %411 = vst.msk [vmem:[%s698_s13 + $0x58] sm:$0xff] %vm399_vm1, %v376_v36  ;;  %v331_v39 = vadd.f32 %v481_v24, %v330_v37  ;;  %v371_v40 = vadd.f32 %v481_v24, %v370_v38 }
  0xe5   : > { %v548_v41 = vpop.f32.mrf.mxu0  ;;  %v560_v42 = vpop.f32.mrf.mxu1 }
  0xe6   : > { %402 = vst.msk [vmem:[%s698_s13 + $0x10] sm:$0xff] %vm399_vm1, %v331_v39  ;;  %410 = vst.msk [vmem:[%s698_s13 + $0x50] sm:$0xff] %vm399_vm1, %v371_v40  ;;  %v346_v43 = vadd.f32 %v548_v41, %v481_v24  ;;  %v386_v44 = vadd.f32 %v560_v42, %v481_v24 }
  0xe7   : > { %v340_v45 = vpop.f32.mrf.mxu0  ;;  %v380_v46 = vpop.f32.mrf.mxu1 }
  0xe8   : > { %405 = vst.msk [vmem:[%s698_s13 + $0x28] sm:$0xff] %vm399_vm1, %v346_v43  ;;  %413 = vst.msk [vmem:[%s698_s13 + $0x68] sm:$0xff] %vm399_vm1, %v386_v44  ;;  %v341_v47 = vadd.f32 %v481_v24, %v340_v45  ;;  %v381_v48 = vadd.f32 %v481_v24, %v380_v46 }
  0xe9   : > { %v551_v49 = vpop.f32.mrf.mxu0  ;;  %v563_v50 = vpop.f32.mrf.mxu1 }
  0xea   : > { %404 = vst.msk [vmem:[%s698_s13 + $0x20] sm:$0xff] %vm399_vm1, %v341_v47  ;;  %412 = vst.msk [vmem:[%s698_s13 + $0x60] sm:$0xff] %vm399_vm1, %v381_v48  ;;  %v356_v51 = vadd.f32 %v551_v49, %v481_v24  ;;  %v396_v52 = vadd.f32 %v563_v50, %v481_v24 }
  0xeb   : > { %v350_v53 = vpop.f32.mrf.mxu0  ;;  %v390_v54 = vpop.f32.mrf.mxu1 }
  0xec   : > { %407 = vst.msk [vmem:[%s698_s13 + $0x38] sm:$0xff] %vm399_vm1, %v356_v51  ;;  %415 = vst.msk [vmem:[%s698_s13 + $0x78] sm:$0xff] %vm399_vm1, %v396_v52  ;;  %v351_v55 = vadd.f32 %v481_v24, %v350_v53  ;;  %v391_v56 = vadd.f32 %v481_v24, %v390_v54 }
  0xee   : > { %406 = vst.msk [vmem:[%s698_s13 + $0x30] sm:$0xff] %vm399_vm1, %v351_v55  ;;  %414 = vst.msk [vmem:[%s698_s13 + $0x70] sm:$0xff] %vm399_vm1, %v391_v56 }
  0xef PF: > { %s13_s12 = sadd.s32 1, %s594_s12  }
  0xf0   : > { %p10_p4 = scmp.ge.s32.totalorder %s13_s12, 4  }
  0xf2   :  { %12 = sbr.rel (!%p10_p4) target bundleno = 1 (0x1), region = 62 }

</bundles_post_ra>
